<compile_context>
chip_gen: v6e
topology: v6e:2x2x1
jax: 0.10.0
libtpu: 0.0.40
codegen_flags: <defaults>
</compile_context>

<pallas_src>
import functools

import jax
import jax.numpy as jnp
from jax.experimental import pallas as pl
from jax.experimental.pallas import tpu as pltpu


def _round_up(n, m):
    return ((n + m - 1) // m) * m


def _mlp_kernel(x_ref,
                w1_ref, b1_ref,
                w2_ref, b2_ref,
                w3_ref, b3_ref,
                w4_ref, b4_ref,
                o_ref):
    # x_ref: (F, tb) bf16, weights (out, in) bf16, biases (out, 1) f32.
    # Layer 1: Linear(64 -> 64) + ReLU
    h = jnp.dot(w1_ref[...], x_ref[...], preferred_element_type=jnp.float32)
    h = jnp.maximum(h + b1_ref[...], 0.0).astype(jnp.bfloat16)
    # Layer 2: Linear(64 -> 32) + ReLU
    h = jnp.dot(w2_ref[...], h, preferred_element_type=jnp.float32)
    h = jnp.maximum(h + b2_ref[...], 0.0).astype(jnp.bfloat16)
    # Layer 3: Linear(32 -> 16) + ReLU
    h = jnp.dot(w3_ref[...], h, preferred_element_type=jnp.float32)
    h = jnp.maximum(h + b3_ref[...], 0.0).astype(jnp.bfloat16)
    # Layer 4: Linear(16 -> 1) + Sigmoid   (z is a lane-dense (1, tb) slab)
    z = jnp.dot(w4_ref[...], h, preferred_element_type=jnp.float32) + b4_ref[...]
    # sigmoid = 1 / (1 + exp(-z)); exp + approx reciprocal both land on the EUP.
    o_ref[...] = pl.reciprocal(1.0 + jnp.exp(-z), approx=True).astype(o_ref.dtype)


def discriminator_forward(x, params, *, batch_tile=None):
    """x: (B, input_size) float32.  params: dict w1..w4 (out,in), b1..b4 (out,).

    Returns (B, 1) float32, matching nn.Sequential(Linear,ReLU,...,Sigmoid).
    """
    B, F = x.shape

    # Lane-dense batch tile: multiple of 128, default capped at 2048 rows
    # (x tile = (64, 2048) bf16 = 256 KiB -> well under scoped VMEM even
    # double-buffered, and >= 2 grid steps for large B so v7x's two
    # TensorCores both get work via dimension_semantics=("parallel",)).
    if batch_tile is None:
        tb = min(2048, _round_up(B, 128))
    else:
        tb = batch_tile
    tb = _round_up(max(tb, 128), 128)
    Bp = _round_up(B, tb)

    # Wrapper-side layout plumbing: pad batch, transpose so batch -> lanes,
    # cast the streaming activation and the (tiny) weights to bf16.
    x_pad = jnp.pad(x, ((0, Bp - B), (0, 0)))
    xT = x_pad.T.astype(jnp.bfloat16)                     # (F, Bp)

    w1 = params["w1"].astype(jnp.bfloat16)                # (64, F)
    w2 = params["w2"].astype(jnp.bfloat16)                # (32, 64)
    w3 = params["w3"].astype(jnp.bfloat16)                # (16, 32)
    w4 = params["w4"].astype(jnp.bfloat16)                # (1, 16)
    b1 = params["b1"].reshape(-1, 1).astype(jnp.float32)  # (64, 1)
    b2 = params["b2"].reshape(-1, 1).astype(jnp.float32)  # (32, 1)
    b3 = params["b3"].reshape(-1, 1).astype(jnp.float32)  # (16, 1)
    b4 = params["b4"].reshape(-1, 1).astype(jnp.float32)  # (1, 1)

    def full_spec(arr):
        # whole (small) parameter tensor resident for every grid step
        return pl.BlockSpec(arr.shape, lambda i: (0, 0))

    out_t = pl.pallas_call(
        _mlp_kernel,
        out_shape=jax.ShapeDtypeStruct((1, Bp), jnp.float32),
        grid=(Bp // tb,),
        in_specs=[
            pl.BlockSpec((F, tb), lambda i: (0, i)),
            full_spec(w1), full_spec(b1),
            full_spec(w2), full_spec(b2),
            full_spec(w3), full_spec(b3),
            full_spec(w4), full_spec(b4),
        ],
        out_specs=pl.BlockSpec((1, tb), lambda i: (0, i)),
        compiler_params=pltpu.CompilerParams(
            dimension_semantics=("parallel",)),
    )(xT, w1, b1, w2, b2, w3, b3, w4, b4)

    # (1, Bp) lane-dense slab -> (B, 1) like the PyTorch module.
    return out_t[0, :B].reshape(B, 1).astype(x.dtype)


def init_params(key, input_size=64):
    """Deterministic synthetic init, PyTorch nn.Linear layout: w (out,in), b (out,)."""
    sizes = [(input_size, 64), (64, 32), (32, 16), (16, 1)]
    params = {}
    for idx, (fin, fout) in enumerate(sizes, start=1):
        key, kw, kb = jax.random.split(key, 3)
        bound = 1.0 / jnp.sqrt(fin)  # same scale as PyTorch default Linear init
        params[f"w{idx}"] = jax.random.uniform(
            kw, (fout, fin), jnp.float32, -bound, bound)
        params[f"b{idx}"] = jax.random.uniform(
            kb, (fout,), jnp.float32, -bound, bound)
    return params


def reference_forward(x, params):
    h = jnp.maximum(x @ params["w1"].T + params["b1"], 0.0)
    h = jnp.maximum(h @ params["w2"].T + params["b2"], 0.0)
    h = jnp.maximum(h @ params["w3"].T + params["b3"], 0.0)
    return jax.nn.sigmoid(h @ params["w4"].T + params["b4"]).reshape(-1, 1)


if __name__ == "__main__":
    key = jax.random.PRNGKey(0)
    kx, kx2, kp = jax.random.split(key, 3)

    input_size = 64
    params = init_params(kp, input_size=input_size)

    # Small test (B < 128 exercises batch padding).
    batch = 8
    x = jax.random.normal(kx, (batch, input_size), jnp.float32)
    out = jax.block_until_ready(discriminator_forward(x, params))
    ref = reference_forward(x, params)
    assert out.shape == (batch, 1)
    # bf16 matmul operands + approx-reciprocal sigmoid -> loose tolerance.
    assert jnp.allclose(out, ref, atol=2e-2, rtol=2e-2), "mismatch vs reference (small)"

    # Multi-tile test (non-multiple-of-128 batch, several grid steps).
    batch2 = 300
    x2 = jax.random.normal(kx2, (batch2, input_size), jnp.float32)
    out2 = jax.block_until_ready(
        discriminator_forward(x2, params, batch_tile=128))
    ref2 = reference_forward(x2, params)
    assert out2.shape == (batch2, 1)
    assert jnp.allclose(out2, ref2, atol=2e-2, rtol=2e-2), "mismatch vs reference (tiled)"

    print("KERNEL_OK")
</pallas_src>

<mosaic_0001>
module attributes {stable_mosaic.version = 11 : i64} {
  func.func @_mlp_kernel(%arg0: i32, %arg1: memref<64x128xbf16, #tpu.memory_space<vmem>>, %arg2: memref<64x64xbf16, #tpu.memory_space<vmem>>, %arg3: memref<64x1xf32, #tpu.memory_space<vmem>>, %arg4: memref<32x64xbf16, #tpu.memory_space<vmem>>, %arg5: memref<32x1xf32, #tpu.memory_space<vmem>>, %arg6: memref<16x32xbf16, #tpu.memory_space<vmem>>, %arg7: memref<16x1xf32, #tpu.memory_space<vmem>>, %arg8: memref<1x16xbf16, #tpu.memory_space<vmem>>, %arg9: memref<1x1xf32, #tpu.memory_space<vmem>>, %arg10: memref<1x128xf32, #tpu.memory_space<vmem>>) attributes {dimension_semantics = [#tpu.dimension_semantics<parallel>], iteration_bounds = array<i64: 1>, scalar_prefetch = 0 : i64, scratch_operands = 0 : i64, tpu.core_type = #tpu.core_type<tc>, window_params = [{transform_indices = @transform_0, window_bounds = array<i64: 64, 128>}, {pipeline_mode = #tpu.pipeline_mode<synchronous>, transform_indices = @transform_1, window_bounds = array<i64: 64, 64>}, {pipeline_mode = #tpu.pipeline_mode<synchronous>, transform_indices = @transform_2, window_bounds = array<i64: 64, 1>}, {pipeline_mode = #tpu.pipeline_mode<synchronous>, transform_indices = @transform_3, window_bounds = array<i64: 32, 64>}, {pipeline_mode = #tpu.pipeline_mode<synchronous>, transform_indices = @transform_4, window_bounds = array<i64: 32, 1>}, {pipeline_mode = #tpu.pipeline_mode<synchronous>, transform_indices = @transform_5, window_bounds = array<i64: 16, 32>}, {pipeline_mode = #tpu.pipeline_mode<synchronous>, transform_indices = @transform_6, window_bounds = array<i64: 16, 1>}, {pipeline_mode = #tpu.pipeline_mode<synchronous>, transform_indices = @transform_7, window_bounds = array<i64: 1, 16>}, {pipeline_mode = #tpu.pipeline_mode<synchronous>, transform_indices = @transform_8, window_bounds = array<i64: 1, 1>}, {transform_indices = @transform_9, window_bounds = array<i64: 1, 128>}]} {
    %c0 = arith.constant 0 : index
    %c0_0 = arith.constant 0 : index
    %0 = vector.load %arg2[%c0, %c0_0] : memref<64x64xbf16, #tpu.memory_space<vmem>>, vector<64x64xbf16>
    %c0_1 = arith.constant 0 : index
    %c0_2 = arith.constant 0 : index
    %1 = vector.load %arg1[%c0_1, %c0_2] : memref<64x128xbf16, #tpu.memory_space<vmem>>, vector<64x128xbf16>
    %cst = arith.constant dense<0.000000e+00> : vector<64x128xf32>
    %2 = tpu.matmul %0, %1, %cst {dimension_numbers = #tpu.dot_dimension_numbers<[1], [0], [0], [1], [0, 0, 1, 1], [], []>} : vector<64x64xbf16>, vector<64x128xbf16>, vector<64x128xf32> -> vector<64x128xf32>
    %c0_3 = arith.constant 0 : index
    %c0_4 = arith.constant 0 : index
    %3 = vector.load %arg3[%c0_3, %c0_4] : memref<64x1xf32, #tpu.memory_space<vmem>>, vector<64x1xf32>
    %4 = vector.broadcast %3 : vector<64x1xf32> to vector<64x128xf32>
    %5 = arith.addf %2, %4 : vector<64x128xf32>
    %cst_5 = arith.constant 0.000000e+00 : f32
    %6 = vector.broadcast %cst_5 : f32 to vector<64x128xf32>
    %7 = arith.maximumf %5, %6 : vector<64x128xf32>
    %8 = arith.truncf %7 : vector<64x128xf32> to vector<64x128xbf16>
    %c0_6 = arith.constant 0 : index
    %c0_7 = arith.constant 0 : index
    %9 = vector.load %arg4[%c0_6, %c0_7] : memref<32x64xbf16, #tpu.memory_space<vmem>>, vector<32x64xbf16>
    %cst_8 = arith.constant dense<0.000000e+00> : vector<32x128xf32>
    %10 = tpu.matmul %9, %8, %cst_8 {dimension_numbers = #tpu.dot_dimension_numbers<[1], [0], [0], [1], [0, 0, 1, 1], [], []>} : vector<32x64xbf16>, vector<64x128xbf16>, vector<32x128xf32> -> vector<32x128xf32>
    %c0_9 = arith.constant 0 : index
    %c0_10 = arith.constant 0 : index
    %11 = vector.load %arg5[%c0_9, %c0_10] : memref<32x1xf32, #tpu.memory_space<vmem>>, vector<32x1xf32>
    %12 = vector.broadcast %11 : vector<32x1xf32> to vector<32x128xf32>
    %13 = arith.addf %10, %12 : vector<32x128xf32>
    %cst_11 = arith.constant 0.000000e+00 : f32
    %14 = vector.broadcast %cst_11 : f32 to vector<32x128xf32>
    %15 = arith.maximumf %13, %14 : vector<32x128xf32>
    %16 = arith.truncf %15 : vector<32x128xf32> to vector<32x128xbf16>
    %c0_12 = arith.constant 0 : index
    %c0_13 = arith.constant 0 : index
    %17 = vector.load %arg6[%c0_12, %c0_13] : memref<16x32xbf16, #tpu.memory_space<vmem>>, vector<16x32xbf16>
    %cst_14 = arith.constant dense<0.000000e+00> : vector<16x128xf32>
    %18 = tpu.matmul %17, %16, %cst_14 {dimension_numbers = #tpu.dot_dimension_numbers<[1], [0], [0], [1], [0, 0, 1, 1], [], []>} : vector<16x32xbf16>, vector<32x128xbf16>, vector<16x128xf32> -> vector<16x128xf32>
    %c0_15 = arith.constant 0 : index
    %c0_16 = arith.constant 0 : index
    %19 = vector.load %arg7[%c0_15, %c0_16] : memref<16x1xf32, #tpu.memory_space<vmem>>, vector<16x1xf32>
    %20 = vector.broadcast %19 : vector<16x1xf32> to vector<16x128xf32>
    %21 = arith.addf %18, %20 : vector<16x128xf32>
    %cst_17 = arith.constant 0.000000e+00 : f32
    %22 = vector.broadcast %cst_17 : f32 to vector<16x128xf32>
    %23 = arith.maximumf %21, %22 : vector<16x128xf32>
    %24 = arith.truncf %23 : vector<16x128xf32> to vector<16x128xbf16>
    %c0_18 = arith.constant 0 : index
    %c0_19 = arith.constant 0 : index
    %25 = vector.load %arg8[%c0_18, %c0_19] : memref<1x16xbf16, #tpu.memory_space<vmem>>, vector<1x16xbf16>
    %cst_20 = arith.constant dense<0.000000e+00> : vector<1x128xf32>
    %26 = tpu.matmul %25, %24, %cst_20 {dimension_numbers = #tpu.dot_dimension_numbers<[1], [0], [0], [1], [0, 0, 1, 1], [], []>} : vector<1x16xbf16>, vector<16x128xbf16>, vector<1x128xf32> -> vector<1x128xf32>
    %c0_21 = arith.constant 0 : index
    %c0_22 = arith.constant 0 : index
    %27 = vector.load %arg9[%c0_21, %c0_22] : memref<1x1xf32, #tpu.memory_space<vmem>>, vector<1x1xf32>
    %28 = vector.broadcast %27 : vector<1x1xf32> to vector<1x128xf32>
    %29 = arith.addf %26, %28 : vector<1x128xf32>
    %cst_23 = arith.constant 0.000000e+00 : f32
    %30 = vector.broadcast %cst_23 : f32 to vector<1x128xf32>
    %31 = arith.subf %30, %29 : vector<1x128xf32>
    %32 = math.exp %31 : vector<1x128xf32>
    %cst_24 = arith.constant 1.000000e+00 : f32
    %33 = vector.broadcast %cst_24 : f32 to vector<1x128xf32>
    %34 = arith.addf %33, %32 : vector<1x128xf32>
    %35 = tpu.reciprocal %34 {approx = true} : vector<1x128xf32> -> vector<1x128xf32>
    %c0_25 = arith.constant 0 : index
    %c0_26 = arith.constant 0 : index
    %36 = vector.load %arg10[%c0_25, %c0_26] : memref<1x128xf32, #tpu.memory_space<vmem>>, vector<1x128xf32>
    tpu.vector_store %arg10[%c0_25, %c0_26], %35 {strides = array<i32>} : memref<1x128xf32, #tpu.memory_space<vmem>>, vector<1x128xf32>,
    return
  }
  func.func @transform_0(%arg0: i32) -> (i32, i32) {
    %c0_i32 = arith.constant 0 : i32
    %c0_i32_0 = arith.constant 0 : i32
    return %c0_i32, %arg0 : i32, i32
  }
  func.func @transform_1(%arg0: i32) -> (i32, i32) {
    %c0_i32 = arith.constant 0 : i32
    %c0_i32_0 = arith.constant 0 : i32
    %c0_i32_1 = arith.constant 0 : i32
    return %c0_i32, %c0_i32_0 : i32, i32
  }
  func.func @transform_2(%arg0: i32) -> (i32, i32) {
    %c0_i32 = arith.constant 0 : i32
    %c0_i32_0 = arith.constant 0 : i32
    %c0_i32_1 = arith.constant 0 : i32
    return %c0_i32, %c0_i32_0 : i32, i32
  }
  func.func @transform_3(%arg0: i32) -> (i32, i32) {
    %c0_i32 = arith.constant 0 : i32
    %c0_i32_0 = arith.constant 0 : i32
    %c0_i32_1 = arith.constant 0 : i32
    return %c0_i32, %c0_i32_0 : i32, i32
  }
  func.func @transform_4(%arg0: i32) -> (i32, i32) {
    %c0_i32 = arith.constant 0 : i32
    %c0_i32_0 = arith.constant 0 : i32
    %c0_i32_1 = arith.constant 0 : i32
    return %c0_i32, %c0_i32_0 : i32, i32
  }
  func.func @transform_5(%arg0: i32) -> (i32, i32) {
    %c0_i32 = arith.constant 0 : i32
    %c0_i32_0 = arith.constant 0 : i32
    %c0_i32_1 = arith.constant 0 : i32
    return %c0_i32, %c0_i32_0 : i32, i32
  }
  func.func @transform_6(%arg0: i32) -> (i32, i32) {
    %c0_i32 = arith.constant 0 : i32
    %c0_i32_0 = arith.constant 0 : i32
    %c0_i32_1 = arith.constant 0 : i32
    return %c0_i32, %c0_i32_0 : i32, i32
  }
  func.func @transform_7(%arg0: i32) -> (i32, i32) {
    %c0_i32 = arith.constant 0 : i32
    %c0_i32_0 = arith.constant 0 : i32
    %c0_i32_1 = arith.constant 0 : i32
    return %c0_i32, %c0_i32_0 : i32, i32
  }
  func.func @transform_8(%arg0: i32) -> (i32, i32) {
    %c0_i32 = arith.constant 0 : i32
    %c0_i32_0 = arith.constant 0 : i32
    %c0_i32_1 = arith.constant 0 : i32
    return %c0_i32, %c0_i32_0 : i32, i32
  }
  func.func @transform_9(%arg0: i32) -> (i32, i32) {
    %c0_i32 = arith.constant 0 : i32
    %c0_i32_0 = arith.constant 0 : i32
    return %c0_i32, %arg0 : i32, i32
  }
}

</mosaic_0001>

<bundles_post_ra>
// kernel: tpu_custom_call.1
= control target key start
LH: loop header
LB: loop body
LE: loop exit
PB: predicated region body
PF: predicated region fallthrough
CT: control target
= control target key end

     0   :  { %s742_s0 = inlined_call_operand.vmem [shape: bf16[64,128], index: 0, kind: input, shape index: {}]   ;;  %s743_s1 = inlined_call_operand.vmem [shape: bf16[64,64], index: 1, kind: input, shape index: {}]   ;;  %s744_s2 = inlined_call_operand.vmem [shape: f32[64,1], index: 2, kind: input, shape index: {}]   ;;  %s745_s3 = inlined_call_operand.vmem [shape: bf16[32,64], index: 3, kind: input, shape index: {}]   ;;  %s746_s4 = inlined_call_operand.vmem [shape: f32[32,1], index: 4, kind: input, shape index: {}]   ;;  %s747_s5 = inlined_call_operand.vmem [shape: bf16[16,32], index: 5, kind: input, shape index: {}]   ;;  %s748_s6 = inlined_call_operand.vmem [shape: f32[16,1], index: 6, kind: input, shape index: {}]   ;;  %s749_s7 = inlined_call_operand.vmem [shape: bf16[1,16], index: 7, kind: input, shape index: {}]   ;;  %s750_s8 = inlined_call_operand.<no memory space> [shape: f32[1,1], index: 8, kind: input, shape index: {}]   ;;  %s751_s9 = inlined_call_operand.hbm [shape: f32[1,128], index: 9, kind: output, shape index: {}]  }
   0x1   :  { %v14_v0 = vstv %s750_s8 }
   0x2   :  { %15 = vst [vmem:[#allocation2] sm:$0x1] %v14_v0 }
   0x3   :  { %v561_v1 = vld [vmem:[%s742_s0 + $0x18] sm:$0xff]   ;;  %v562_v2 = vld [vmem:[%s742_s0 + $0x10] sm:$0xff]   ;;  %v598_v3 = vmov 0   ;;  %v563_v4 = vld [vmem:[%s742_s0 + $0x8] sm:$0xff]   ;;  %vm144_vm0 = vcmask 523264  }
   0x4   :  { %513 = vmatprep.subr.bf16.mxu0 %v561_v1  ;;  %559 = vset.pattern.permute.xlu0 %v598_v3  ;;  %v565_v5 = vld [vmem:[%s743_s1] sm:$0xff]   ;;  %v58_v7 = vld [vmem:[%s744_s2 + $0x30] sm:$0xff]  ;;  %v59_v9 = vld [vmem:[%s744_s2 + $0x38] sm:$0xff] }
   0x5   :  { %514 = vmatpush3.bf16.msra.mxu0 %v561_v1  ;;  %560 = vset.pattern.permute.xlu1 %v598_v3  ;;  %v564_v6 = vld [vmem:[%s742_s0] sm:$0xff]   ;;  %v57_v10 = vld [vmem:[%s744_s2 + $0x28] sm:$0xff]  ;;  %v54_v12 = vld [vmem:[%s744_s2 + $0x10] sm:$0xff] }
   0x6   :  { %515 = vmatprep.subr.bf16.mxu0 %v562_v2  ;;  %521 = vmatprep.mubr.msk.bf16.mxu0 %vm144_vm0, %v565_v5  ;;  %v56_v8 = vld [vmem:[%s744_s2 + $0x20] sm:$0xff]  ;;  %v566_v11 = vld [vmem:[%s743_s1 + $0x8] sm:$0xff]   ;;  %v55_v13 = vld [vmem:[%s744_s2 + $0x18] sm:$0xff] }
   0x7   :  { %92 = vperm.xlu0 %559, %v58_v7   ;;  %82 = vperm.xlu1 %560, %v56_v8   ;;  %v567_v14 = vld [vmem:[%s743_s1 + $0x10] sm:$0xff]  }
   0x9   :  { %516 = vmatpush3.bf16.msra.mxu0 %v562_v2 }
   0xa   :  { %517 = vmatprep.subr.bf16.mxu0 %v563_v4 }
   0xb   :  { %97 = vperm.xlu0 %559, %v59_v9   ;;  %87 = vperm.xlu1 %560, %v57_v10  }
   0xd   :  { %518 = vmatpush3.bf16.msra.mxu0 %v563_v4 }
   0xe   :  { %519 = vmatprep.subr.bf16.mxu0 %v564_v6 }
  0x11   :  { %520 = vmatpush3.bf16.msra.mxu0 %v564_v6 }
  0x12   :  { %16 = vsyncpa [#allocation4], 0  ;;  %72 = vperm.xlu0 %559, %v54_v12   ;;  %77 = vperm.xlu1 %560, %v55_v13   ;;  %v52_v15 = vld [vmem:[%s744_s2] sm:$0xff]  ;;  %v53_v16 = vld [vmem:[%s744_s2 + $0x8] sm:$0xff]  ;;  %v599_v63 = vmov 0.0   ;;  %vm600_vm1 = vmmov 0  }
  0x13   :  { %v568_v17 = vld [vmem:[%s743_s1 + $0x18] sm:$0xff]   ;;  %v240_v18 = vld [vmem:[%s746_s4 + $0x10] sm:$0xff]  ;;  %v238_v20 = vld [vmem:[%s746_s4] sm:$0xff]  ;;  %549 = vmatprep.subr.bf16.mxu0 %v599_v63  ;;  %vm352_vm2 = vcmask 261120   ;;  %vm411_vm3 = vcmask 130048  }
  0x14   :  { %522 = vmatmul.mubr.msk.bf16.vlgmr.msra.gmra.mxu0 %vm144_vm0, %v566_v11  ;;  %v241_v19 = vld [vmem:[%s746_s4 + $0x18] sm:$0xff]  ;;  %v239_v21 = vld [vmem:[%s746_s4 + $0x8] sm:$0xff]  ;;  %v335_v22 = vld [vmem:[%s748_s6] sm:$0xff] }
  0x15   :  { %525 = vmatprep.mubr.msk.bf16.mxu0 %vm144_vm0, %v567_v14  ;;  %v336_v23 = vld [vmem:[%s748_s6 + $0x8] sm:$0xff]  ;;  %v401_v24 = vld [vmem:[#allocation2] sm:$0x1] }
  0x16   :  { %62 = vperm.xlu0 %559, %v52_v15   ;;  %67 = vperm.xlu1 %560, %v53_v16   ;;  %v569_v25 = vld [vmem:[%s745_s3] sm:$0xff]   ;;  %v570_v62 = vld [vmem:[%s745_s3 + $0x8] sm:$0xff]  }
  0x17   :  { %537 = vmatprep.mubr.msk.bf16.mxu1 %vm144_vm0, %v569_v25 }
  0x1a   :  { %254 = vperm.xlu0 %559, %v240_v18   ;;  %259 = vperm.xlu1 %560, %v241_v19   ;;  %v571_v18 = vld [vmem:[%s747_s5] sm:$0xff]   ;;  %s601_s5 = smov [#allocation3]  }
  0x1c   :  { %526 = vmatmul.mubr.msk.bf16.gmra.mxu0 %vm144_vm0, %v568_v17 }
  0x1d   :  { %551 = vmatprep.mubr.msk.bf16.mxu0 %vm600_vm1, %v599_v63 }
  0x1e   :  { %244 = vperm.xlu0 %559, %v238_v20   ;;  %249 = vperm.xlu1 %560, %v239_v21  }
  0x22   :  { %339 = vperm.xlu0 %559, %v335_v22   ;;  %344 = vperm.xlu1 %560, %v336_v23  }
  0x26   :  { %404 = vperm.xlu0 %559, %v401_v24  }
  0x82   :  { %v83_v26 = vpop.permute.xlu1 %82  ;;  %v93_v28 = vpop.permute.xlu0 %92 }
  0x86   :  { %v88_v31 = vpop.permute.xlu1 %87  ;;  %v98_v33 = vpop.permute.xlu0 %97 }
  0x8d   :  { %v78_v37 = vpop.permute.xlu1 %77  ;;  %v73_v41 = vpop.permute.xlu0 %72 }
  0x91   :  { %v68_v51 = vpop.permute.xlu1 %67  ;;  %v63_v55 = vpop.permute.xlu0 %62 }
  0x95   :  { %v255_v0 = vpop.permute.xlu0 %254  ;;  %v260_v1 = vpop.permute.xlu1 %259 }
  0x99   :  { %v245_v6 = vpop.permute.xlu0 %244  ;;  %v250_v8 = vpop.permute.xlu1 %249 }
  0x9d   :  { %v340_v20 = vpop.permute.xlu0 %339  ;;  %v345_v23 = vpop.permute.xlu1 %344 }
  0xd4   :  { %v523_v27 = vpop.f32.mrf.mxu0 }
  0xd5   :  { %v200_v47 = vadd.f32 %v523_v27, %v73_v41 }
  0xd6   :  { %v191_v29 = vpop.f32.mrf.mxu0 }
  0xd7   :  { %v224_v56 = vmax.f32 %v200_v47, 0.0  ;;  %v192_v57 = vadd.f32 %v191_v29, %v63_v55 }
  0xd8   :  { %v524_v30 = vpop.f32.mrf.mxu0 }
  0xd9   :  { %v203_v43 = vadd.f32 %v524_v30, %v78_v37  ;;  %v222_v60 = vmax.f32 %v192_v57, 0.0  ;;  %v400_v30 = vld [vmem:[%s749_s7] sm:$0x1]  ;;  %s467_s7 = sshll.u32 %s601_s5, 4  ;;  %s468_s7 = int_to_ptr.vmem [resolvable:$true] %s467_s7 }
  0xda   :  { %v194_v32 = vpop.f32.mrf.mxu0  ;;  %s576_s12 = scalar_lea.vmem %s468_s7, 16  ;;  %s580_s13 = scalar_lea.vmem %s468_s7, 32 }
  0xdb   :  { %v225_v52 = vmax.f32 %v203_v43, 0.0  ;;  %v195_v53 = vadd.f32 %v194_v32, %v68_v51  ;;  %p577_p0 = scmp.ne.s32.totalorder %s468_s7, %s576_s12  ;;  %p581_p1 = scmp.lt.s32.totalorder %s468_s7, %s468_s7 }
  0xdc   :  { %v527_v34 = vpop.f32.mrf.mxu0  ;;  %p582_p2 = scmp.lt.s32.totalorder %s580_s13, %s576_s12 }
  0xdd   :  { %v216_v36 = vadd.f32 %v527_v34, %v93_v28  ;;  %v231_v58 = vpack.c.bf16 %v225_v52, %v224_v56  ;;  %v223_v59 = vmax.f32 %v195_v53, 0.0  ;;  %v405_v34 = vpop.permute.xlu0 %404 }
  0xde   :  { %v207_v35 = vpop.f32.mrf.mxu0  ;;  %p583_p3 = por %p582_p2, %p581_p1 }
  0xdf   :  { %v208_v39 = vadd.f32 %v207_v35, %v83_v26  ;;  %v228_v44 = vmax.f32 %v216_v36, 0.0  ;;  %v230_v61 = vpack.c.bf16 %v223_v59, %v222_v60 }
  0xe0   :  { %v528_v38 = vpop.f32.mrf.mxu0  ;;  %p584_p4 = pnand %p583_p3, %p577_p0 }
  0xe1   :  { %v219_v40 = vadd.f32 %v528_v38, %v98_v33  ;;  %v226_v48 = vmax.f32 %v208_v39, 0.0 }
  0xe2   :  { %v210_v42 = vpop.f32.mrf.mxu0 }
  0xe3   :  { %v229_v45 = vmax.f32 %v219_v40, 0.0  ;;  %v211_v46 = vadd.f32 %v210_v42, %v88_v31  ;;  %v407_v31 = vlaneseq }
  0xe5   :  { %v227_v49 = vmax.f32 %v211_v46, 0.0  ;;  %v233_v50 = vpack.c.bf16 %v229_v45, %v228_v44  ;;  %v408_v32 = vshrl.u32 %v407_v31, 7 }
  0xe7   :  { %v232_v54 = vpack.c.bf16 %v227_v49, %v226_v48  ;;  %529 = vmatprep.subr.bf16.mxu1 %v233_v50  ;;  %v409_v33 = vsub.s32 0, %v408_v32 }
  0xe8   :  { %530 = vmatpush3.bf16.msra.mxu1 %v233_v50 }
  0xe9   :  { %531 = vmatprep.subr.bf16.mxu1 %v232_v54  ;;  %v410_v35 = vrot.slane %v405_v34, %v409_v33 }
  0xec   :  { %532 = vmatpush3.bf16.msra.mxu1 %v232_v54 }
  0xed   :  { %533 = vmatprep.subr.bf16.mxu1 %v231_v58 }
  0xf0   :  { %534 = vmatpush3.bf16.msra.mxu1 %v231_v58 }
  0xf1   :  { %535 = vmatprep.subr.bf16.mxu1 %v230_v61 }
  0xf4   :  { %536 = vmatpush3.bf16.msra.mxu1 %v230_v61 }
  0xf5   :  { %541 = vmatprep.subr.bf16.mxu1 %v599_v63 }
  0xf7   :  { %538 = vmatmul.mubr.msk.bf16.vlgmr.msra.gmra.mxu1 %vm144_vm0, %v570_v62 }
  0xf8   :  { %545 = vmatprep.mubr.msk.bf16.mxu1 %vm600_vm1, %v599_v63 }
 0x1b7   :  { %v539_v2 = vpop.f32.mrf.mxu1 }
 0x1b8   :  { %v321_v4 = vadd.f32 %v539_v2, %v255_v0 }
 0x1b9   :  { %v312_v3 = vpop.f32.mrf.mxu1 }
 0x1ba   :  { %v329_v10 = vmax.f32 %v321_v4, 0.0  ;;  %v313_v11 = vadd.f32 %v312_v3, %v245_v6 }
 0x1bb   :  { %v540_v5 = vpop.f32.mrf.mxu1 }
 0x1bc   :  { %v324_v7 = vadd.f32 %v540_v5, %v260_v1  ;;  %v327_v16 = vmax.f32 %v313_v11, 0.0 }
 0x1bd   :  { %v315_v9 = vpop.f32.mrf.mxu1 }
 0x1be   :  { %v330_v12 = vmax.f32 %v324_v7, 0.0  ;;  %v316_v13 = vadd.f32 %v315_v9, %v250_v8 }
 0x1c0   :  { %v332_v14 = vpack.c.bf16 %v330_v12, %v329_v10  ;;  %v328_v15 = vmax.f32 %v316_v13, 0.0 }
 0x1c2   :  { %542 = vmatpush3.bf16.msra.mxu1 %v332_v14  ;;  %v331_v17 = vpack.c.bf16 %v328_v15, %v327_v16 }
 0x1c3   :  { %543 = vmatprep.subr.bf16.mxu1 %v599_v63 }
 0x1c6   :  { %544 = vmatpush3.bf16.msra.mxu1 %v331_v17 }
 0x1c9   :  { %546 = vmatmul.mubr.msk.bf16.vlgmr.msra.gmra.mxu1 %vm352_vm2, %v571_v18 }
 0x289   :  { %v390_v19 = vpop.f32.mrf.mxu1 }
 0x28a   :  { %v391_v22 = vadd.f32 %v390_v19, %v340_v20 }
 0x28b   :  { %v547_v21 = vpop.f32.mrf.mxu1 }
 0x28c   :  { %v397_v27 = vmax.f32 %v391_v22, 0.0 }
 0x28d   :  { %v393_v24 = vpop.f32.mrf.mxu1 }
 0x28e   :  { %v394_v25 = vadd.f32 %v393_v24, %v345_v23 }
 0x28f   :  { %v548_v26 = vpop.f32.mrf.mxu1 }
 0x290   :  { %v398_v28 = vmax.f32 %v394_v25, 0.0 }
 0x292   :  { %v399_v29 = vpack.c.bf16 %v398_v28, %v397_v27 }
 0x294   :  { %550 = vmatpush3.bf16.msra.mxu0 %v399_v29 }
 0x297   :  { %552 = vmatmul.mubr.msk.bf16.vlgmr.msra.gmra.mxu0 %vm411_vm3, %v400_v30 }
 0x357   :  { %v449_v36 = vpop.f32.mrf.mxu0 }
 0x358   :  { %v450_v37 = vadd.f32 %v449_v36, %v410_v35 }
 0x359   :  { %v553_v38 = vpop.f32.mrf.mxu0 }
 0x35a   :  { %v455_v39 = vsub.f32 0.0, %v450_v37 }
 0x35b   :  { %v452_v40 = vpop.f32.mrf.mxu0 }
 0x35c   :  { %v456_v41 = vmul.f32 1.442695, %v455_v39 }
 0x35d   :  { %v554_v42 = vpop.f32.mrf.mxu0 }
 0x35e   :  { %572 = vpow2.f32 %v456_v41 }
 0x36b   :  { %v573_v43 = vpop.eup %572 }
 0x36c   :  { %v458_v44 = vadd.f32 1.0, %v573_v43 }
 0x36e   :  { %574 = vrcp.f32 %v458_v44 }
 0x37b   :  { %v575_v45 = vpop.eup %574 }
 0x37c   :  { %460 = vst [vmem:[#allocation3] sm:$0x1] %v575_v45 }
 0x37d   :  { %587 = shalt.err (!%p584_p4)
}
 0x37e   :  { %470 = dma.vmem_to_hbm [thread:$0]  %s468_s7, 16, %s751_s9, [#allocation4]  }
 0x37f   :  { %596 = dma.done.wait [#allocation4], 16  }
 0x380   :  { %597 = vsyncadd [#allocation4], 4294967280 }
 0x381   :  { %474 = vsyncpa [#allocation4], 1 }

</bundles_post_ra>
